<compile_context>
chip_gen: v6e
topology: v6e:2x2x1
jax: 0.10.0
libtpu: 0.0.40
codegen_flags: <defaults>
</compile_context>

<pallas_src>
import jax
import jax.numpy as jnp
from jax.experimental import pallas as pl
from jax.experimental.pallas import tpu as pltpu

BATCH = 2
SEQ = 8
HIDDEN = 32
VOCAB = 100
NUM_CLASSES = 3


def _sbert_fused_kernel(ids_ref, tok_ref, posseg_ref, w_ref, b_ref, o_ref):
    """Fused embedder + pool + projection + softmax.

    ids:    (2*B*S, 1) int32   stacked [p ; h] token ids, row = pair*B*S + b*S + s
    tok:    (VOCAB, H) f32     token embedding table
    posseg: (S, H)     f32     position + segment(0) embedding table (pre-summed)
    w:      (3H, C)    f32     projection weight, pre-transposed
    b:      (1, C)     f32     projection bias
    out:    (B, C)     f32     softmax probabilities
    """
    B, S, H, V = BATCH, SEQ, HIDDEN, VOCAB
    n_rows = 2 * B * S

    # ---- fused embedding gather: one-hot @ table on the MXU ------------------
    ids = ids_ref[...]                                            # (2B*S, 1) int32
    one_hot = (ids == jax.lax.broadcasted_iota(jnp.int32, (n_rows, V), 1)
               ).astype(jnp.float32)                              # (2B*S, V)
    tok_emb = jnp.dot(one_hot, tok_ref[...],
                      preferred_element_type=jnp.float32)         # (2B*S, H)

    # token + (position + segment[0]) embeddings, viewed as (2B, S, H)
    x = tok_emb.reshape(2 * B, S, H) + posseg_ref[...][None, :, :]

    # ---- pooling: masked full-tile MAX over tokens 1..S-2 --------------------
    # (matches the reference 'mean' pooler branch, which does x[:,1:-1,:].max(1))
    pos_idx = jax.lax.broadcasted_iota(jnp.int32, (2 * B, S, H), 1)
    keep = (pos_idx >= 1) & (pos_idx <= S - 2)
    pooled = jnp.max(jnp.where(keep, x, -jnp.inf), axis=1)        # (2B, H)

    p1 = pooled[0:B, :]                                           # (B, H)
    p2 = pooled[B:2 * B, :]                                       # (B, H)
    d = jnp.abs(p1 - p2)                                          # (B, H)

    # ---- projection: three static slices of W, summed (no lane concat) -------
    w = w_ref[...]                                                # (3H, C)
    logits = (jnp.dot(p1, w[0:H, :], preferred_element_type=jnp.float32)
              + jnp.dot(p2, w[H:2 * H, :], preferred_element_type=jnp.float32)
              + jnp.dot(d, w[2 * H:3 * H, :], preferred_element_type=jnp.float32)
              + b_ref[...])                                       # (B, C)

    # ---- softmax over classes (EUP reciprocal) --------------------------------
    m = jnp.max(logits, axis=1, keepdims=True)
    e = jnp.exp(logits - m)
    inv = pl.reciprocal(jnp.sum(e, axis=1, keepdims=True), approx=True)
    o_ref[...] = e * inv


def sbert_forward(p_ids, h_ids, tok, pos, seg, W, b):
    """p_ids/h_ids: (B, S) int32 token ids; returns (B, NUM_CLASSES) probs."""
    B, S = p_ids.shape
    assert S >= 3, "pooling over tokens 1..S-2 requires S >= 3"

    # stack the two sentences -> one DMA, flatten so the in-kernel gather is a
    # single (2B*S, V) one-hot matmul.
    ids = jnp.concatenate([p_ids, h_ids], axis=0).reshape(2 * B * S, 1)
    ids = ids.astype(jnp.int32)

    # seg_ids are all zero in the reference forward -> fold pos + seg[0] once.
    posseg = pos + seg[0][None, :]              # (S, H)
    w_t = W.T                                   # (3H, C)
    b_row = b.reshape(1, NUM_CLASSES)           # (1, C)

    vmem = pl.BlockSpec(memory_space=pltpu.MemorySpace.VMEM)
    return pl.pallas_call(
        _sbert_fused_kernel,
        out_shape=jax.ShapeDtypeStruct((B, NUM_CLASSES), jnp.float32),
        in_specs=[vmem] * 5,
        out_specs=vmem,
    )(ids, tok, posseg, w_t, b_row)


# ---------------- deterministic synthetic embedder tables --------------------
def make_embedder_params(key):
    k_tok, k_pos, k_seg = jax.random.split(key, 3)
    tok = jax.random.normal(k_tok, (VOCAB, HIDDEN), jnp.float32) * 0.02
    pos = jax.random.normal(k_pos, (SEQ, HIDDEN), jnp.float32) * 0.02
    seg = jax.random.normal(k_seg, (2, HIDDEN), jnp.float32) * 0.02
    return tok, pos, seg


if __name__ == "__main__":
    key = jax.random.PRNGKey(0)
    k_emb, k_w, k_b, k_p, k_h = jax.random.split(key, 5)

    tok, pos, seg = make_embedder_params(k_emb)

    # nn.Linear(3*H, 3): weight (3, 3H), bias (3,)
    W = jax.random.normal(k_w, (NUM_CLASSES, 3 * HIDDEN), jnp.float32) * 0.1
    b = jax.random.normal(k_b, (NUM_CLASSES,), jnp.float32) * 0.1

    # token-id inputs p, h: (B, S) int32
    p = jax.random.randint(k_p, (BATCH, SEQ), 0, VOCAB, dtype=jnp.int32)
    h = jax.random.randint(k_h, (BATCH, SEQ), 0, VOCAB, dtype=jnp.int32)

    run = jax.jit(lambda p_, h_: sbert_forward(p_, h_, tok, pos, seg, W, b))
    out = jax.block_until_ready(run(p, h))

    # plain-JAX reference (embedder with seg_ids = 0, 'mean' pooler branch == max)
    def ref_forward(p_ids, h_ids):
        def embed(ids):
            return tok[ids] + pos[None, :, :] + seg[0][None, None, :]
        x1, x2 = embed(p_ids), embed(h_ids)
        p1 = jnp.max(x1[:, 1:-1, :], axis=1)
        p2 = jnp.max(x2[:, 1:-1, :], axis=1)
        feat = jnp.concatenate([p1, p2, jnp.abs(p1 - p2)], axis=1)
        logits = feat @ W.T + b
        return jax.nn.softmax(logits, axis=1)

    expected = ref_forward(p, h)
    assert out.shape == (BATCH, NUM_CLASSES)
    # tolerance loosened slightly: softmax denominator uses the EUP approx reciprocal
    assert jnp.allclose(out, expected, atol=5e-3, rtol=5e-3), "kernel mismatch"
    print("KERNEL_OK")
</pallas_src>

<mosaic_0001>
module attributes {stable_mosaic.version = 11 : i64} {
  func.func @_sbert_fused_kernel(%arg0: memref<32x1xi32, #tpu.memory_space<vmem>>, %arg1: memref<100x32xf32, #tpu.memory_space<vmem>>, %arg2: memref<8x32xf32, #tpu.memory_space<vmem>>, %arg3: memref<96x3xf32, #tpu.memory_space<vmem>>, %arg4: memref<1x3xf32, #tpu.memory_space<vmem>>, %arg5: memref<2x3xf32, #tpu.memory_space<vmem>>) attributes {dimension_semantics = [], scalar_prefetch = 0 : i64, scratch_operands = 0 : i64, tpu.core_type = #tpu.core_type<tc>} {
    %c0 = arith.constant 0 : index
    %c0_0 = arith.constant 0 : index
    %0 = vector.load %arg0[%c0, %c0_0] : memref<32x1xi32, #tpu.memory_space<vmem>>, vector<32x1xi32>
    %1 = tpu.iota {dimensions = array<i32: 1>} : vector<32x100xi32>
    %2 = vector.broadcast %0 : vector<32x1xi32> to vector<32x100xi32>
    %3 = arith.cmpi eq, %2, %1 : vector<32x100xi32>
    %4 = arith.extui %3 : vector<32x100xi1> to vector<32x100xi32>
    %5 = arith.sitofp %4 : vector<32x100xi32> to vector<32x100xf32>
    %c0_1 = arith.constant 0 : index
    %c0_2 = arith.constant 0 : index
    %6 = vector.load %arg1[%c0_1, %c0_2] : memref<100x32xf32, #tpu.memory_space<vmem>>, vector<100x32xf32>
    %cst = arith.constant dense<0.000000e+00> : vector<32x32xf32>
    %7 = tpu.matmul %5, %6, %cst {dimension_numbers = #tpu.dot_dimension_numbers<[1], [0], [0], [1], [0, 0, 1, 1], [], []>} : vector<32x100xf32>, vector<100x32xf32>, vector<32x32xf32> -> vector<32x32xf32>
    %8 = vector.shape_cast %7 : vector<32x32xf32> to vector<4x8x32xf32>
    %c0_3 = arith.constant 0 : index
    %c0_4 = arith.constant 0 : index
    %9 = vector.load %arg2[%c0_3, %c0_4] : memref<8x32xf32, #tpu.memory_space<vmem>>, vector<8x32xf32>
    %10 = vector.shape_cast %9 : vector<8x32xf32> to vector<1x8x32xf32>
    %11 = vector.broadcast %10 : vector<1x8x32xf32> to vector<4x8x32xf32>
    %12 = arith.addf %8, %11 : vector<4x8x32xf32>
    %13 = tpu.iota {dimensions = array<i32: 1>} : vector<4x8x32xi32>
    %c1_i32 = arith.constant 1 : i32
    %14 = vector.broadcast %c1_i32 : i32 to vector<4x8x32xi32>
    %15 = arith.cmpi sge, %13, %14 : vector<4x8x32xi32>
    %c6_i32 = arith.constant 6 : i32
    %16 = vector.broadcast %c6_i32 : i32 to vector<4x8x32xi32>
    %17 = arith.cmpi sle, %13, %16 : vector<4x8x32xi32>
    %18 = arith.andi %15, %17 : vector<4x8x32xi1>
    %cst_5 = arith.constant 0xFF800000 : f32
    %19 = vector.broadcast %cst_5 : f32 to vector<4x8x32xf32>
    %20 = arith.select %18, %12, %19 : vector<4x8x32xi1>, vector<4x8x32xf32>
    %cst_6 = arith.constant dense<0xFF800000> : vector<4x32xf32>
    %21 = vector.multi_reduction <maximumf>, %20, %cst_6 [1] : vector<4x8x32xf32> to vector<4x32xf32>
    %22 = vector.extract_strided_slice %21 {offsets = [0, 0], sizes = [2, 32], strides = [1, 1]} : vector<4x32xf32> to vector<2x32xf32>
    %23 = vector.extract_strided_slice %21 {offsets = [2, 0], sizes = [2, 32], strides = [1, 1]} : vector<4x32xf32> to vector<2x32xf32>
    %24 = arith.subf %22, %23 : vector<2x32xf32>
    %25 = math.absf %24 : vector<2x32xf32>
    %c0_7 = arith.constant 0 : index
    %c0_8 = arith.constant 0 : index
    %26 = vector.load %arg3[%c0_7, %c0_8] : memref<96x3xf32, #tpu.memory_space<vmem>>, vector<96x3xf32>
    %27 = vector.extract_strided_slice %26 {offsets = [0, 0], sizes = [32, 3], strides = [1, 1]} : vector<96x3xf32> to vector<32x3xf32>
    %cst_9 = arith.constant dense<0.000000e+00> : vector<2x3xf32>
    %28 = tpu.matmul %22, %27, %cst_9 {dimension_numbers = #tpu.dot_dimension_numbers<[1], [0], [0], [1], [0, 0, 1, 1], [], []>} : vector<2x32xf32>, vector<32x3xf32>, vector<2x3xf32> -> vector<2x3xf32>
    %29 = vector.extract_strided_slice %26 {offsets = [32, 0], sizes = [32, 3], strides = [1, 1]} : vector<96x3xf32> to vector<32x3xf32>
    %cst_10 = arith.constant dense<0.000000e+00> : vector<2x3xf32>
    %30 = tpu.matmul %23, %29, %cst_10 {dimension_numbers = #tpu.dot_dimension_numbers<[1], [0], [0], [1], [0, 0, 1, 1], [], []>} : vector<2x32xf32>, vector<32x3xf32>, vector<2x3xf32> -> vector<2x3xf32>
    %31 = arith.addf %28, %30 : vector<2x3xf32>
    %32 = vector.extract_strided_slice %26 {offsets = [64, 0], sizes = [32, 3], strides = [1, 1]} : vector<96x3xf32> to vector<32x3xf32>
    %cst_11 = arith.constant dense<0.000000e+00> : vector<2x3xf32>
    %33 = tpu.matmul %25, %32, %cst_11 {dimension_numbers = #tpu.dot_dimension_numbers<[1], [0], [0], [1], [0, 0, 1, 1], [], []>} : vector<2x32xf32>, vector<32x3xf32>, vector<2x3xf32> -> vector<2x3xf32>
    %34 = arith.addf %31, %33 : vector<2x3xf32>
    %c0_12 = arith.constant 0 : index
    %c0_13 = arith.constant 0 : index
    %35 = vector.load %arg4[%c0_12, %c0_13] : memref<1x3xf32, #tpu.memory_space<vmem>>, vector<1x3xf32>
    %36 = vector.broadcast %35 : vector<1x3xf32> to vector<2x3xf32>
    %37 = arith.addf %34, %36 : vector<2x3xf32>
    %cst_14 = arith.constant dense<0xFF800000> : vector<2xf32>
    %38 = vector.multi_reduction <maximumf>, %37, %cst_14 [1] : vector<2x3xf32> to vector<2xf32>
    %39 = vector.shape_cast %38 : vector<2xf32> to vector<2x1xf32>
    %40 = vector.broadcast %39 : vector<2x1xf32> to vector<2x3xf32>
    %41 = arith.subf %37, %40 : vector<2x3xf32>
    %42 = math.exp %41 : vector<2x3xf32>
    %cst_15 = arith.constant dense<0.000000e+00> : vector<2xf32>
    %43 = vector.multi_reduction <add>, %42, %cst_15 [1] : vector<2x3xf32> to vector<2xf32>
    %44 = vector.shape_cast %43 : vector<2xf32> to vector<2x1xf32>
    %45 = tpu.reciprocal %44 {approx = true} : vector<2x1xf32> -> vector<2x1xf32>
    %46 = vector.broadcast %45 : vector<2x1xf32> to vector<2x3xf32>
    %47 = arith.mulf %42, %46 : vector<2x3xf32>
    %c0_16 = arith.constant 0 : index
    %c0_17 = arith.constant 0 : index
    %48 = vector.load %arg5[%c0_16, %c0_17] : memref<2x3xf32, #tpu.memory_space<vmem>>, vector<2x3xf32>
    tpu.vector_store %arg5[%c0_16, %c0_17], %47 {strides = array<i32>} : memref<2x3xf32, #tpu.memory_space<vmem>>, vector<2x3xf32>,
    return
  }
}

</mosaic_0001>

<bundles_post_ra>
// kernel: _lambda_.1
= control target key start
LH: loop header
LB: loop body
LE: loop exit
PB: predicated region body
PF: predicated region fallthrough
CT: control target
= control target key end

     0   :  { %10 = vsyncpa [#allocation3], 0  ;;  %s819_s0 = inlined_call_operand.vmem [shape: s32[32,1], index: 0, kind: input, shape index: {}]   ;;  %s820_s1 = inlined_call_operand.hbm [shape: f32[100,32], index: 1, kind: input, shape index: {}]   ;;  %s821_s2 = inlined_call_operand.vmem [shape: f32[8,32], index: 2, kind: input, shape index: {}]   ;;  %s822_s3 = inlined_call_operand.hbm [shape: f32[96,3], index: 3, kind: input, shape index: {}]   ;;  %s823_s4 = inlined_call_operand.vmem [shape: f32[1,3], index: 4, kind: input, shape index: {}]   ;;  %s824_s5 = inlined_call_operand.hbm [shape: f32[2,3], index: 5, kind: output, shape index: {}]  }
   0x1   :  { %11 = vsyncpa [#allocation6], 0 }
   0x2   :  { %12 = vsyncpa [#allocation4], 0  ;;  %s707_s18 = smov [#allocation2]  }
   0x3   :  { %s20_s19 = sshll.u32 %s707_s18, 4  ;;  %s21_s19 = int_to_ptr.vmem [resolvable:$true] %s20_s19 }
   0x4   :  { %s649_s20 = scalar_lea.vmem %s21_s19, 1664  ;;  %p654_p1 = scmp.lt.s32.totalorder %s21_s19, %s21_s19 }
   0x5   :  { %p650_p0 = scmp.ne.s32.totalorder %s21_s19, %s649_s20  ;;  %p655_p2 = scmp.lt.s32.totalorder %s649_s20, %s649_s20 }
   0x7   :  { %p656_p3 = por %p655_p2, %p654_p1 }
   0x9   :  { %p657_p4 = pnand %p656_p3, %p650_p0 }
   0xb   :  { %660 = shalt.err (!%p657_p4)
}
   0xc   :  { %s708_s21 = smov 128   ;;  %s709_s22 = smov 8  }
   0xd   :  { %26 = dma.hbm_to_vmem [thread:$0]  %s820_s1, 1664, %s21_s19, [#allocation3], %s708_s21, %s708_s21, %s709_s22  }
   0xe   :  { %s710_s25 = smov [#allocation5]  }
   0xf   :  { %s34_s26 = sshll.u32 %s710_s25, 4  ;;  %s35_s26 = int_to_ptr.vmem [resolvable:$true] %s34_s26 }
  0x10   :  { %s669_s27 = scalar_lea.vmem %s35_s26, 1536  ;;  %p674_p6 = scmp.lt.s32.totalorder %s35_s26, %s35_s26 }
  0x11   :  { %p670_p5 = scmp.ne.s32.totalorder %s35_s26, %s669_s27  ;;  %p675_p7 = scmp.lt.s32.totalorder %s669_s27, %s669_s27 }
  0x13   :  { %p676_p8 = por %p675_p7, %p674_p6 }
  0x15   :  { %p677_p9 = pnand %p676_p8, %p670_p5 }
  0x17   :  { %680 = shalt.err (!%p677_p9)
}
  0x18   :  { %40 = dma.hbm_to_vmem [thread:$0]  %s822_s3, 1536, %s35_s26, [#allocation6], %s708_s21, %s708_s21, %s709_s22  }
  0x19   :  { %701 = dma.done.wait [#allocation3], 1664  }
  0x1a   :  { %702 = vsyncadd [#allocation3], 4294965632 }
  0x1b   :  { %703 = dma.done.wait [#allocation6], 1536  }
  0x1c   :  { %704 = vsyncadd [#allocation6], 4294965760  ;;  %v711_v0 = vmov 0   ;;  %v712_v1 = vmov 0.0   ;;  %vm105_vm0 = vcmask 1043456   ;;  %v51_v2 = vld [vmem:[%s819_s0 + $0x10] sm:$0xff]  ;;  %v53_v19 = vlaneseq }
  0x1d   :  { %636 = vset.pattern.permute.xlu1 %v711_v0  ;;  %635 = vset.pattern.permute.xlu0 %v711_v0  ;;  %v49_v3 = vld [vmem:[%s819_s0] sm:$0xff]  ;;  %v90_v5 = vld [vmem:[#allocation2 + $0x58] sm:$0xff]  ;;  %v50_v7 = vld [vmem:[%s819_s0 + $0x8] sm:$0xff]  ;;  %vm92_vm1 = vcmask 818176   ;;  %vm713_vm6 = vmmov 0   ;;  %vm208_vm10 = vcmask 261120  }
  0x1e   :  { %594 = vmatprep.subr.mxu1 %v712_v1  ;;  %62 = vperm.xlu1 %636, %v51_v2   ;;  %v91_v4 = vld [vmem:[#allocation2 + $0x60] sm:$0xf]  ;;  %v52_v6 = vld [vmem:[%s819_s0 + $0x18] sm:$0xff]  ;;  %v89_v8 = vld [vmem:[#allocation2 + $0x50] sm:$0xff]  ;;  %v54_v20 = vand.u32 127, %v53_v19  ;;  %v200_v33 = vshrl.u32 %v53_v19, 7 }
  0x1f   :  { %56 = vperm.xlu0 %635, %v49_v3   ;;  %562 = vmatprep.subr.msk.mxu0 %vm105_vm0, %v91_v4  ;;  %v88_v9 = vld [vmem:[#allocation2 + $0x48] sm:$0xff]  ;;  %v87_v10 = vld [vmem:[#allocation2 + $0x40] sm:$0xff]  ;;  %v86_v11 = vld [vmem:[#allocation2 + $0x38] sm:$0xff]  ;;  %vm255_vm11 = vcmask 1041409   ;;  %vm488_vm12 = vcmask 17408   ;;  %s714_s13 = smov [#allocation7]  }
  0x20   :  { %563 = vmatpush3.msk.msra.mxu0 %vm105_vm0, %v91_v4  ;;  %v85_v12 = vld [vmem:[#allocation2 + $0x30] sm:$0xff]  ;;  %v84_v13 = vld [vmem:[#allocation2 + $0x28] sm:$0xff]  ;;  %v83_v14 = vld [vmem:[#allocation2 + $0x20] sm:$0xff]  ;;  %602 = vmatprep.mubr.msk.f32.mxu1 %vm713_vm6, %v712_v1  ;;  %vm201_vm7 = vcmp.ge.s32.totalorder %v200_v33, 1  ;;  %vm202_vm8 = vcmp.le.s32.totalorder %v200_v33, 6  ;;  %s507_s14 = sshll.u32 %s714_s13, 4  ;;  %s508_s14 = int_to_ptr.vmem [resolvable:$true] %s507_s14 }
  0x21   :  { %564 = vmatprep.subr.mxu0 %v90_v5  ;;  %v82_v15 = vld [vmem:[#allocation2 + $0x18] sm:$0xff]  ;;  %v81_v16 = vld [vmem:[#allocation2 + $0x10] sm:$0xff]  ;;  %v80_v17 = vld [vmem:[#allocation2 + $0x8] sm:$0xff]  ;;  %p686_p11 = scmp.lt.s32.totalorder %s508_s14, %s508_s14 }
  0x22   :  { %65 = vperm.xlu1 %636, %v52_v6   ;;  %565 = vmatpush3.msra.mxu0 %v90_v5  ;;  %v79_v18 = vld [vmem:[#allocation2] sm:$0xff]  ;;  %v247_v30 = vld [vmem:[#allocation5 + $0x30] sm:$0xff]  ;;  %v246_v31 = vld [vmem:[#allocation5 + $0x28] sm:$0xff] }
  0x23   :  { %59 = vperm.xlu0 %635, %v50_v7   ;;  %566 = vmatprep.subr.mxu0 %v89_v8  ;;  %v248_v29 = vld [vmem:[#allocation5 + $0x38] sm:$0xff]  ;;  %v245_v32 = vld [vmem:[#allocation5 + $0x20] sm:$0xff]  ;;  %vm777_vm9 = vmand %vm201_vm7, %vm202_vm8 }
  0x24   :  { %567 = vmatpush3.msra.mxu0 %v89_v8  ;;  %595 = vmatpush3.msra.mxu1 %v248_v29  ;;  %v194_v34 = vld [vmem:[%s821_s2] sm:$0xff] }
  0x25   :  { %568 = vmatprep.subr.mxu0 %v88_v9  ;;  %596 = vmatprep.subr.mxu1 %v712_v1 }
  0x26   :  { %569 = vmatpush3.msra.mxu0 %v88_v9  ;;  %597 = vmatpush3.msra.mxu1 %v247_v30  ;;  %v244_v9 = vld [vmem:[#allocation5 + $0x18] sm:$0xff] }
  0x27   :  { %570 = vmatprep.subr.mxu0 %v87_v10  ;;  %598 = vmatprep.subr.mxu1 %v712_v1 }
  0x28   :  { %571 = vmatpush3.msra.mxu0 %v87_v10  ;;  %599 = vmatpush3.msra.mxu1 %v246_v31 }
  0x29   :  { %572 = vmatprep.subr.mxu0 %v86_v11  ;;  %600 = vmatprep.subr.mxu1 %v712_v1 }
  0x2a   :  { %573 = vmatpush3.msra.mxu0 %v86_v11  ;;  %601 = vmatpush3.msra.mxu1 %v245_v32 }
  0x2b   :  { %574 = vmatprep.subr.mxu0 %v85_v12  ;;  %605 = vmatprep.subr.mxu1 %v712_v1 }
  0x2c   :  { %575 = vmatpush3.msra.mxu0 %v85_v12  ;;  %v243_v12 = vld [vmem:[#allocation5 + $0x10] sm:$0xff] }
  0x2d   :  { %576 = vmatprep.subr.mxu0 %v84_v13 }
  0x2e   :  { %577 = vmatpush3.msra.mxu0 %v84_v13 }
  0x2f   :  { %578 = vmatprep.subr.mxu0 %v83_v14 }
  0x30   :  { %579 = vmatpush3.msra.mxu0 %v83_v14  ;;  %v242_v14 = vld [vmem:[#allocation5 + $0x8] sm:$0xff] }
  0x31   :  { %580 = vmatprep.subr.mxu0 %v82_v15 }
  0x32   :  { %581 = vmatpush3.msra.mxu0 %v82_v15 }
  0x33   :  { %582 = vmatprep.subr.mxu0 %v81_v16 }
  0x34   :  { %583 = vmatpush3.msra.mxu0 %v81_v16  ;;  %v241_v16 = vld [vmem:[#allocation5] sm:$0xff] }
  0x35   :  { %584 = vmatprep.subr.mxu0 %v80_v17 }
  0x36   :  { %585 = vmatpush3.msra.mxu0 %v80_v17 }
  0x37   :  { %586 = vmatprep.subr.mxu0 %v79_v18 }
  0x38   :  { %587 = vmatpush3.msra.mxu0 %v79_v18  ;;  %v252_v18 = vld [vmem:[#allocation5 + $0x58] sm:$0xff] }
  0x99   :  { %v63_v21 = vpop.permute.xlu1 %62 }
  0x9a   :  { %v57_v22 = vpop.permute.xlu0 %56  ;;  %vm69_vm3 = vcmp.eq.s32.totalorder %v63_v21, %v54_v20  ;;  %v251_v21 = vld [vmem:[#allocation5 + $0x50] sm:$0xff] }
  0x9b   :  { %vm67_vm2 = vcmp.eq.s32.totalorder %v57_v22, %v54_v20  ;;  %v519_v26 = vsel %vm69_vm3, 1.0, %v712_v1 }
  0x9c   :  { %v517_v23 = vsel %vm67_vm2, 1.0, %v712_v1 }
  0x9d   :  { %588 = vmatprep.mubr.msk.f32.mxu0 %vm92_vm1, %v517_v23  ;;  %v66_v24 = vpop.permute.xlu1 %65  ;;  %v250_v23 = vld [vmem:[#allocation5 + $0x48] sm:$0xff] }
  0x9e   :  { %v60_v25 = vpop.permute.xlu0 %59  ;;  %vm70_vm5 = vcmp.eq.s32.totalorder %v66_v24, %v54_v20 }
  0x9f   :  { %vm68_vm4 = vcmp.eq.s32.totalorder %v60_v25, %v54_v20  ;;  %v520_v28 = vsel %vm70_vm5, 1.0, %v712_v1  ;;  %v249_v25 = vld [vmem:[#allocation5 + $0x40] sm:$0xff] }
  0xa0   :  { %v518_v27 = vsel %vm68_vm4, 1.0, %v712_v1 }
  0xa1   :  { %589 = vmatmul.mubr.msk.f32.vlgmr.msra.gmra.mxu0 %vm92_vm1, %v518_v27 }
  0xa2   :  { %591 = vmatprep.mubr.msk.f32.mxu0 %vm92_vm1, %v519_v26 }
  0xa5   :  { %592 = vmatmul.mubr.msk.f32.gmra.mxu0 %vm92_vm1, %v520_v28 }
 0x161   :  { %v590_v35 = vpop.f32.mrf.mxu0 }
 0x162   :  { %v196_v37 = vadd.f32 %v590_v35, %v194_v34 }
 0x163   :  { %v175_v38 = vpop.f32.mrf.mxu0 }
 0x164   :  { %v205_v39 = vsel %vm777_vm9, %v196_v37, -inf  ;;  %v195_v40 = vadd.f32 %v194_v34, %v175_v38 }
 0x165   :  { %v593_v41 = vpop.f32.mrf.mxu0  ;;  %v216_v44 = vsel %vm208_vm10, %v205_v39, -inf }
 0x166   :  { %v204_v42 = vsel %vm777_vm9, %v195_v40, -inf  ;;  %v198_v43 = vadd.f32 %v593_v41, %v194_v34  ;;  %v217_v51 = vrot.slane %v216_v44, 4 }
 0x167   :  { %v209_v45 = vsel %vm208_vm10, %v204_v42, -inf  ;;  %v185_v46 = vpop.f32.mrf.mxu0 }
 0x168   :  { %v210_v47 = vrot.slane %v209_v45, 4  ;;  %v207_v48 = vsel %vm777_vm9, %v198_v43, -inf  ;;  %v197_v49 = vadd.f32 %v194_v34, %v185_v46  ;;  %v218_v58 = vmax.f32 %v216_v44, %v217_v51  ;;  %v529_v34 = vld [vmem:[%s823_s4] ss:$0 sm:$0xff]  ;;  %s681_s4 = scalar_lea.vmem %s508_s14, 32 }
 0x169   :  { %v230_v50 = vsel %vm208_vm10, %v207_v48, -inf  ;;  %p682_p10 = scmp.ne.s32.totalorder %s508_s14, %s681_s4  ;;  %p687_p12 = scmp.lt.s32.totalorder %s681_s4, %s681_s4 }
 0x16a   :  { %v231_v52 = vrot.slane %v230_v50, 4  ;;  %v206_v53 = vsel %vm777_vm9, %v197_v49, -inf  ;;  %v211_v55 = vmax.f32 %v209_v45, %v210_v47  ;;  %v219_v0 = vrot.slane %v218_v58, 2 }
 0x16b   :  { %v223_v54 = vsel %vm208_vm10, %v206_v53, -inf  ;;  %p688_p13 = por %p687_p12, %p686_p11 }
 0x16c   :  { %v232_v56 = vmax.f32 %v230_v50, %v231_v52  ;;  %v224_v57 = vrot.slane %v223_v54, 4  ;;  %v212_v61 = vrot.slane %v211_v55, 2  ;;  %v220_v6 = vmax.f32 %v218_v58, %v219_v0 }
 0x16d   :  { %p689_p0 = pnand %p688_p13, %p682_p10 }
 0x16e   :  { %v233_v59 = vrot.slane %v232_v56, 2  ;;  %v225_v60 = vmax.f32 %v223_v54, %v224_v57  ;;  %v213_v4 = vmax.f32 %v211_v55, %v212_v61  ;;  %v221_v13 = vrot.slane %v220_v6, 1 }
 0x170   :  { %v234_v62 = vmax.f32 %v232_v56, %v233_v59  ;;  %v226_v63 = vrot.slane %v225_v60, 2  ;;  %v214_v10 = vrot.slane %v213_v4, 1  ;;  %v222_v17 = vmax.f32 %v220_v6, %v221_v13 }
 0x172   :  { %v235_v2 = vrot.slane %v234_v62, 1  ;;  %v227_v3 = vmax.f32 %v225_v60, %v226_v63  ;;  %v215_v15 = vmax.f32 %v213_v4, %v214_v10 }
 0x174   :  { %v228_v5 = vrot.slane %v227_v3, 1  ;;  %v236_v8 = vmax.f32 %v234_v62, %v235_v2  ;;  %v331_v20 = vsel %vm255_vm11, %v222_v17, %v215_v15 }
 0x176   :  { %v229_v7 = vmax.f32 %v227_v3, %v228_v5  ;;  %v238_v22 = vsub.f32 %v222_v17, %v236_v8 }
 0x178   :  { %v256_v11 = vsel %vm255_vm11, %v236_v8, %v229_v7  ;;  %v237_v19 = vsub.f32 %v215_v15, %v229_v7  ;;  %v240_v26 = vand.u32 2147483647, %v238_v22 }
 0x179   :  { %603 = vmatmul.mubr.msk.f32.vlgmr.msra.gmra.mxu1 %vm208_vm10, %v256_v11 }
 0x17a   :  { %606 = vmatpush3.msra.mxu1 %v244_v9  ;;  %613 = vmatprep.mubr.msk.f32.mxu1 %vm713_vm6, %v712_v1  ;;  %v239_v24 = vand.u32 2147483647, %v237_v19 }
 0x17b   :  { %607 = vmatprep.subr.mxu1 %v712_v1 }
 0x17c   :  { %608 = vmatpush3.msra.mxu1 %v243_v12  ;;  %v406_v27 = vsel %vm255_vm11, %v240_v26, %v239_v24 }
 0x17d   :  { %609 = vmatprep.subr.mxu1 %v712_v1 }
 0x17e   :  { %610 = vmatpush3.msra.mxu1 %v242_v14 }
 0x17f   :  { %611 = vmatprep.subr.mxu1 %v712_v1 }
 0x180   :  { %612 = vmatpush3.msra.mxu1 %v241_v16 }
 0x181   :  { %614 = vmatmul.mubr.msk.f32.vlgmr.msra.gmra.mxu1 %vm208_vm10, %v331_v20  ;;  %616 = vmatprep.subr.mxu1 %v712_v1 }
 0x182   :  { %617 = vmatpush3.msra.mxu1 %v252_v18  ;;  %624 = vmatprep.mubr.msk.f32.mxu1 %vm713_vm6, %v712_v1 }
 0x183   :  { %618 = vmatprep.subr.mxu1 %v712_v1 }
 0x184   :  { %619 = vmatpush3.msra.mxu1 %v251_v21 }
 0x185   :  { %620 = vmatprep.subr.mxu1 %v712_v1 }
 0x186   :  { %621 = vmatpush3.msra.mxu1 %v250_v23 }
 0x187   :  { %622 = vmatprep.subr.mxu1 %v712_v1 }
 0x188   :  { %623 = vmatpush3.msra.mxu1 %v249_v25 }
 0x189   :  { %625 = vmatmul.mubr.msk.f32.vlgmr.msra.gmra.mxu1 %vm208_vm10, %v406_v27 }
 0x239   :  { %v325_v28 = vpop.f32.mrf.mxu1 }
 0x23b   :  { %v604_v29 = vpop.f32.mrf.mxu1 }
 0x241   :  { %v400_v30 = vpop.f32.mrf.mxu1 }
 0x242   :  { %v401_v32 = vadd.f32 %v400_v30, %v325_v28 }
 0x243   :  { %v615_v31 = vpop.f32.mrf.mxu1 }
 0x249   :  { %v475_v33 = vpop.f32.mrf.mxu1 }
 0x24a   :  { %v479_v35 = vadd.f32 %v475_v33, %v401_v32 }
 0x24b   :  { %v626_v36 = vpop.f32.mrf.mxu1 }
 0x24c   :  { %v487_v37 = vadd.f32 %v529_v34, %v479_v35 }
 0x24e   :  { %v489_v1 = vsel %vm488_vm12, %v487_v37, -inf }
 0x24f   :  { %490 = vmax.xlane.f32.xlu0 %v489_v1 }
 0x2d8   :  { %v491_v38 = vpop.xlane.xlu0 %490 }
 0x2d9   :  { %v492_v39 = vsub.f32 %v487_v37, %v491_v38 }
 0x2db   :  { %v493_v40 = vmul.f32 1.442695, %v492_v39 }
 0x2dd   :  { %637 = vpow2.f32 %v493_v40 }
 0x2ea   :  { %v638_v41 = vpop.eup %637 }
 0x2eb   :  { %v495_v42 = vsel %vm488_vm12, %v638_v41, 0.0 }
 0x2ec   :  { %496 = vadd.xlane.f32.xlu1 %v495_v42 }
 0x375   :  { %v497_v43 = vpop.xlane.xlu1 %496 }
 0x376   :  { %639 = vrcp.f32 %v497_v43 }
 0x383   :  { %v640_v44 = vpop.eup %639 }
 0x384   :  { %v499_v45 = vmul.f32 %v640_v44, %v638_v41 }
 0x386   :  { %500 = vst.msk [vmem:[#allocation7] sm:$0x3] %vm488_vm12, %v499_v45 }
 0x387   :  { %692 = shalt.err (!%p689_p0)
}
 0x388   :  { %510 = dma.vmem_to_hbm [thread:$0]  %s508_s14, 32, %s824_s5, [#allocation4]  }
 0x389   :  { %705 = dma.done.wait [#allocation4], 32  }
 0x38a   :  { %706 = vsyncadd [#allocation4], 4294967264 }
 0x38b   :  { %514 = vsyncpa [#allocation3], 1 }
 0x38c   :  { %515 = vsyncpa [#allocation6], 1 }
 0x38d   :  { %516 = vsyncpa [#allocation4], 1 }

</bundles_post_ra>
